<compile_context>
chip_gen: v7x
topology: tpu7x:2x2x1
jax: 0.10.0
libtpu: 0.0.40
codegen_flags: <defaults>
</compile_context>

<pallas_src>
import functools

import jax
import jax.numpy as jnp
from jax.experimental import pallas as pl
from jax.experimental.pallas import tpu as pltpu

LN_EPS = 1e-6  # config.layer_norm_eps


# ------------------------------ kernel helpers -------------------------------
def _layernorm(x, w, b):
    mu = jnp.mean(x, axis=-1, keepdims=True)
    xc = x - mu
    var = jnp.mean(xc * xc, axis=-1, keepdims=True)
    return xc * jax.lax.rsqrt(var + LN_EPS) * w + b


def _gelu(x):
    # TODO(synk): HF "gelu" is exact erf-GELU; tanh-approx used for Mosaic
    # lowering compatibility (the in-file reference uses the same approximation).
    return jax.nn.gelu(x, approximate=True)


# ------------------------------ fused layer kernel ---------------------------
def layer_kernel(x_ref,
                 wq_ref, bq_ref, wk_ref, bk_ref, wv_ref, bv_ref,
                 wo_ref, bo_ref,
                 aln_w_ref, aln_b_ref,
                 fln_w_ref, fln_b_ref, w1_ref, b1_ref, w2_ref, b2_ref,
                 nln_w_ref, nln_b_ref,
                 o_ref, *, heads, dim_head, apply_final_norm, full_seq):
    """One transformer layer (attention + FF, both with residuals) for one
    (batch element, query-token tile) grid step.  K/V context is the full
    sequence of this batch element (x_ref is the whole (N, D) slab)."""
    tq = o_ref.shape[0]
    cdt = wq_ref.dtype  # MXU compute dtype (bf16 in production, f32 here)

    # ---------------- attention (pre-norm) ----------------
    x_full = x_ref[...].astype(jnp.float32)                       # (N, D)
    ln_w = aln_w_ref[...]
    ln_b = aln_b_ref[...]
    h_ctx = _layernorm(x_full, ln_w, ln_b)                        # (N, D)
    if full_seq:
        # single token tile per batch element: LN / K / V computed exactly once
        x_q = x_full
        h_q = h_ctx
    else:
        t = pl.program_id(1)
        q0 = pl.multiple_of(t * tq, tq)
        x_q = x_ref[pl.ds(q0, tq), :].astype(jnp.float32)         # (tq, D)
        h_q = _layernorm(x_q, ln_w, ln_b)                         # (tq, D)

    # Lane-dense fused projections: (., D) @ (D, H*dh) -> (., H*dh).
    # Softmax scale is already folded into w_q / b_q.
    q = jnp.dot(h_q.astype(cdt), wq_ref[...],
                preferred_element_type=jnp.float32) + bq_ref[...]   # (tq, H*dh)
    k = jnp.dot(h_ctx.astype(cdt), wk_ref[...],
                preferred_element_type=jnp.float32) + bk_ref[...]   # (N, H*dh)
    v = jnp.dot(h_ctx.astype(cdt), wv_ref[...],
                preferred_element_type=jnp.float32) + bv_ref[...]   # (N, H*dh)

    # Per-head attention with plain 2-D matmuls (static lane slices; heads is
    # a static Python loop -> unrolled; no lane-splitting reshape needed).
    ctx_parts = []
    for h in range(heads):
        sl = slice(h * dim_head, (h + 1) * dim_head)
        q_h = q[:, sl].astype(cdt)                                  # (tq, dh)
        k_h = k[:, sl].astype(cdt)                                  # (N, dh)
        v_h = v[:, sl].astype(cdt)                                  # (N, dh)
        dots = jax.lax.dot_general(q_h, k_h, (((1,), (1,)), ((), ())),
                                   preferred_element_type=jnp.float32)  # (tq, N)
        m = jnp.max(dots, axis=-1, keepdims=True)
        e = jnp.exp(dots - m)
        denom = jnp.sum(e, axis=-1, keepdims=True)
        p = e * pl.reciprocal(denom, approx=True)                   # EUP slot
        ctx_parts.append(jnp.dot(p.astype(cdt), v_h,
                                 preferred_element_type=jnp.float32))  # (tq, dh)

    ctx = jnp.concatenate(ctx_parts, axis=-1)                       # (tq, H*dh)
    attn_out = jnp.dot(ctx.astype(cdt), wo_ref[...],
                       preferred_element_type=jnp.float32) + bo_ref[...]
    x1 = x_q + attn_out                                             # residual

    # ---------------- feed-forward (pre-norm) ----------------
    h_ff = _layernorm(x1, fln_w_ref[...], fln_b_ref[...])
    h1 = _gelu(jnp.dot(h_ff.astype(cdt), w1_ref[...],
                       preferred_element_type=jnp.float32) + b1_ref[...])
    h2 = jnp.dot(h1.astype(cdt), w2_ref[...],
                 preferred_element_type=jnp.float32) + b2_ref[...]
    x2 = x1 + h2                                                    # residual

    if apply_final_norm:                 # folded final LayerNorm (last layer)
        x2 = _layernorm(x2, nln_w_ref[...], nln_b_ref[...])
    o_ref[...] = x2.astype(o_ref.dtype)


# ------------------------------ pallas_call glue ------------------------------
def _resident_spec(arr):
    """Full-array block whose block index never changes -> stays VMEM-resident
    across all grid steps (weights / small params).
    TODO(synk): request single buffering for these constant-index specs once
    pipeline_mode=pl.Buffered(1) is validated on all target generations."""
    nd = arr.ndim
    return pl.BlockSpec(arr.shape, lambda b, t, _nd=nd: (0,) * _nd)


def _pick_token_tile(n, *, target=512):
    """Prefer the full sequence per grid step (no LN / K / V recompute).  For
    longer sequences pick the largest divisor <= target that is a multiple of
    8 (f32 sublane; use 16 if activations are bf16)."""
    if n <= target:
        return n
    for t in range(target, 7, -1):
        if n % t == 0 and t % 8 == 0:
            return t
    return n


def transformer_layer(x, lp, final_ln, *, heads, dim_head, apply_final_norm,
                      token_tile, vmem_limit_bytes=48 * 1024 * 1024):
    # vmem_limit_bytes default is v7x-safe (64 MiB physical per TC); raise
    # toward ~96-112 MiB on v5e/v6e (128 MiB VMEM) for larger token tiles.
    B, N, D = x.shape
    assert lp['w_q'].shape == (D, heads * dim_head)
    args = (x,
            lp['w_q'], lp['b_q'], lp['w_k'], lp['b_k'], lp['w_v'], lp['b_v'],
            lp['w_o'], lp['b_o'], lp['aln_w'], lp['aln_b'],
            lp['fln_w'], lp['fln_b'], lp['w1'], lp['b1'], lp['w2'], lp['b2'],
            final_ln['w'], final_ln['b'])
    in_specs = ([pl.BlockSpec((None, N, D), lambda b, t: (b, 0, 0))]  # full ctx per batch elt
                + [_resident_spec(a) for a in args[1:]])
    out_specs = pl.BlockSpec((None, token_tile, D), lambda b, t: (b, t, 0))
    kernel = functools.partial(layer_kernel, heads=heads, dim_head=dim_head,
                               apply_final_norm=apply_final_norm,
                               full_seq=(token_tile == N))
    return pl.pallas_call(
        kernel,
        grid=(B, N // token_tile),
        in_specs=in_specs,
        out_specs=out_specs,
        out_shape=jax.ShapeDtypeStruct(x.shape, x.dtype),
        compiler_params=pltpu.CompilerParams(
            dimension_semantics=("parallel", "parallel"),
            vmem_limit_bytes=vmem_limit_bytes),
    )(*args)


def transformer_forward(x, params):
    layers = params['layers']
    assert layers, "Transformer must have at least one layer"
    heads, dim_head = params['heads'], params['dim_head']
    token_tile = _pick_token_tile(x.shape[1])
    # TODO(synk): prefetch layer i+1 weights behind layer i compute with a
    # cross-call DMA future (start copy in one pallas_call, consume sem+VMEM
    # ref in the next); weight HBM traffic is the roofline at small B*N.
    for i, lp in enumerate(layers):
        x = transformer_layer(x, lp, params['final_norm'],
                              heads=heads, dim_head=dim_head,
                              apply_final_norm=(i == len(layers) - 1),
                              token_tile=token_tile)
    return x


# --------------------------------- param init ---------------------------------
def init_params(key, *, dim, layers, heads, dim_head, mlp_dim,
                param_dtype=jnp.float32):
    """Parameters in kernel layout.  The softmax scale dim_head**-0.5 is folded
    into w_q / b_q (identical math to the PyTorch module's `dots * scale`).
    For production on v6e/v7x pass param_dtype=jnp.bfloat16 (MXU dtype follows
    the weight dtype; LN/softmax/residual math stays f32 in-kernel)."""
    inner = heads * dim_head
    scale = dim_head ** -0.5
    params = {'layers': [], 'heads': heads, 'dim_head': dim_head}
    for _ in range(layers):
        key, kq, kbq, kk, kbk, kv, kbv, ko, kbo, k1, kb1, k2, kb2 = \
            jax.random.split(key, 13)
        lp = {
            'aln_w': jnp.ones((1, dim), param_dtype),
            'aln_b': jnp.zeros((1, dim), param_dtype),
            'w_q': (scale * 0.02 * jax.random.normal(kq, (dim, inner))).astype(param_dtype),
            'b_q': (scale * 0.02 * jax.random.normal(kbq, (1, inner))).astype(param_dtype),
            'w_k': (0.02 * jax.random.normal(kk, (dim, inner))).astype(param_dtype),
            'b_k': (0.02 * jax.random.normal(kbk, (1, inner))).astype(param_dtype),
            'w_v': (0.02 * jax.random.normal(kv, (dim, inner))).astype(param_dtype),
            'b_v': (0.02 * jax.random.normal(kbv, (1, inner))).astype(param_dtype),
            'w_o': (0.02 * jax.random.normal(ko, (inner, dim))).astype(param_dtype),
            'b_o': (0.02 * jax.random.normal(kbo, (1, dim))).astype(param_dtype),
            'fln_w': jnp.ones((1, dim), param_dtype),
            'fln_b': jnp.zeros((1, dim), param_dtype),
            'w1': (0.02 * jax.random.normal(k1, (dim, mlp_dim))).astype(param_dtype),
            'b1': (0.02 * jax.random.normal(kb1, (1, mlp_dim))).astype(param_dtype),
            'w2': (0.02 * jax.random.normal(k2, (mlp_dim, dim))).astype(param_dtype),
            'b2': (0.02 * jax.random.normal(kb2, (1, dim))).astype(param_dtype),
        }
        params['layers'].append(lp)
    params['final_norm'] = {'w': jnp.ones((1, dim), param_dtype),
                            'b': jnp.zeros((1, dim), param_dtype)}
    return params


# ------------------------------ pure-JAX reference -----------------------------
def reference_forward(x, params):
    def ln(y, w, b):
        mu = jnp.mean(y, -1, keepdims=True)
        var = jnp.mean((y - mu) ** 2, -1, keepdims=True)
        return (y - mu) * jax.lax.rsqrt(var + LN_EPS) * w + b

    H, dh = params['heads'], params['dim_head']
    for p in params['layers']:
        B, N, _ = x.shape
        h = ln(x, p['aln_w'], p['aln_b'])
        q = (h @ p['w_q'] + p['b_q']).reshape(B, N, H, dh).transpose(0, 2, 1, 3)
        k = (h @ p['w_k'] + p['b_k']).reshape(B, N, H, dh).transpose(0, 2, 1, 3)
        v = (h @ p['w_v'] + p['b_v']).reshape(B, N, H, dh).transpose(0, 2, 1, 3)
        dots = jnp.einsum('bhqe,bhke->bhqk', q, k)     # scale folded into w_q/b_q
        attn = jax.nn.softmax(dots, axis=-1)
        ctx = jnp.einsum('bhqk,bhke->bhqe', attn, v)
        ctx = ctx.transpose(0, 2, 1, 3).reshape(B, N, H * dh)
        x = ctx @ p['w_o'] + p['b_o'] + x

        h = ln(x, p['fln_w'], p['fln_b'])
        h = jax.nn.gelu(h @ p['w1'] + p['b1'], approximate=True)
        x = h @ p['w2'] + p['b2'] + x
    fn = params['final_norm']
    return ln(x, fn['w'], fn['b'])


# ------------------------------------ main -------------------------------------
if __name__ == "__main__":
    B, N = 2, 8                     # batch, tokens
    dim, layers, heads, dim_head, mlp_dim = 32, 2, 4, 8, 64

    key = jax.random.PRNGKey(0)
    kx, kp = jax.random.split(key)
    x = jax.random.normal(kx, (B, N, dim), jnp.float32)
    params = init_params(kp, dim=dim, layers=layers, heads=heads,
                         dim_head=dim_head, mlp_dim=mlp_dim)

    out = jax.block_until_ready(transformer_forward(x, params))
    ref = reference_forward(x, params)
    assert out.shape == ref.shape == (B, N, dim)
    # slightly looser tolerance: approx-reciprocal softmax denominator.
    err = float(jnp.max(jnp.abs(out - ref)))
    assert err < 5e-3, f"mismatch vs reference: max abs err = {err}"

    print("KERNEL_OK")
</pallas_src>

<mosaic_0001>
module attributes {stable_mosaic.version = 11 : i64} {
  func.func @layer_kernel(%arg0: i32, %arg1: i32, %arg2: memref<1x8x32xf32, #tpu.memory_space<vmem>>, %arg3: memref<32x32xf32, #tpu.memory_space<vmem>>, %arg4: memref<1x32xf32, #tpu.memory_space<vmem>>, %arg5: memref<32x32xf32, #tpu.memory_space<vmem>>, %arg6: memref<1x32xf32, #tpu.memory_space<vmem>>, %arg7: memref<32x32xf32, #tpu.memory_space<vmem>>, %arg8: memref<1x32xf32, #tpu.memory_space<vmem>>, %arg9: memref<32x32xf32, #tpu.memory_space<vmem>>, %arg10: memref<1x32xf32, #tpu.memory_space<vmem>>, %arg11: memref<1x32xf32, #tpu.memory_space<vmem>>, %arg12: memref<1x32xf32, #tpu.memory_space<vmem>>, %arg13: memref<1x32xf32, #tpu.memory_space<vmem>>, %arg14: memref<1x32xf32, #tpu.memory_space<vmem>>, %arg15: memref<32x64xf32, #tpu.memory_space<vmem>>, %arg16: memref<1x64xf32, #tpu.memory_space<vmem>>, %arg17: memref<64x32xf32, #tpu.memory_space<vmem>>, %arg18: memref<1x32xf32, #tpu.memory_space<vmem>>, %arg19: memref<1x32xf32, #tpu.memory_space<vmem>>, %arg20: memref<1x32xf32, #tpu.memory_space<vmem>>, %arg21: memref<1x8x32xf32, #tpu.memory_space<vmem>>) attributes {dimension_semantics = [#tpu.dimension_semantics<parallel>, #tpu.dimension_semantics<parallel>], iteration_bounds = array<i64: 2, 1>, scalar_prefetch = 0 : i64, scratch_operands = 0 : i64, tpu.core_type = #tpu.core_type<tc>, window_params = [{transform_indices = @transform_0, window_bounds = array<i64: 1, 8, 32>}, {pipeline_mode = #tpu.pipeline_mode<synchronous>, transform_indices = @transform_1, window_bounds = array<i64: 32, 32>}, {pipeline_mode = #tpu.pipeline_mode<synchronous>, transform_indices = @transform_2, window_bounds = array<i64: 1, 32>}, {pipeline_mode = #tpu.pipeline_mode<synchronous>, transform_indices = @transform_3, window_bounds = array<i64: 32, 32>}, {pipeline_mode = #tpu.pipeline_mode<synchronous>, transform_indices = @transform_4, window_bounds = array<i64: 1, 32>}, {pipeline_mode = #tpu.pipeline_mode<synchronous>, transform_indices = @transform_5, window_bounds = array<i64: 32, 32>}, {pipeline_mode = #tpu.pipeline_mode<synchronous>, transform_indices = @transform_6, window_bounds = array<i64: 1, 32>}, {pipeline_mode = #tpu.pipeline_mode<synchronous>, transform_indices = @transform_7, window_bounds = array<i64: 32, 32>}, {pipeline_mode = #tpu.pipeline_mode<synchronous>, transform_indices = @transform_8, window_bounds = array<i64: 1, 32>}, {pipeline_mode = #tpu.pipeline_mode<synchronous>, transform_indices = @transform_9, window_bounds = array<i64: 1, 32>}, {pipeline_mode = #tpu.pipeline_mode<synchronous>, transform_indices = @transform_10, window_bounds = array<i64: 1, 32>}, {pipeline_mode = #tpu.pipeline_mode<synchronous>, transform_indices = @transform_11, window_bounds = array<i64: 1, 32>}, {pipeline_mode = #tpu.pipeline_mode<synchronous>, transform_indices = @transform_12, window_bounds = array<i64: 1, 32>}, {pipeline_mode = #tpu.pipeline_mode<synchronous>, transform_indices = @transform_13, window_bounds = array<i64: 32, 64>}, {pipeline_mode = #tpu.pipeline_mode<synchronous>, transform_indices = @transform_14, window_bounds = array<i64: 1, 64>}, {pipeline_mode = #tpu.pipeline_mode<synchronous>, transform_indices = @transform_15, window_bounds = array<i64: 64, 32>}, {pipeline_mode = #tpu.pipeline_mode<synchronous>, transform_indices = @transform_16, window_bounds = array<i64: 1, 32>}, {pipeline_mode = #tpu.pipeline_mode<synchronous>, transform_indices = @transform_17, window_bounds = array<i64: 1, 32>}, {pipeline_mode = #tpu.pipeline_mode<synchronous>, transform_indices = @transform_18, window_bounds = array<i64: 1, 32>}, {transform_indices = @transform_19, window_bounds = array<i64: 1, 8, 32>}]} {
    %c0 = arith.constant 0 : index
    %c0_0 = arith.constant 0 : index
    %c0_1 = arith.constant 0 : index
    %0 = vector.load %arg2[%c0, %c0_0, %c0_1] : memref<1x8x32xf32, #tpu.memory_space<vmem>>, vector<1x8x32xf32>
    %1 = vector.shape_cast %0 : vector<1x8x32xf32> to vector<8x32xf32>
    %c0_2 = arith.constant 0 : index
    %c0_3 = arith.constant 0 : index
    %2 = vector.load %arg11[%c0_2, %c0_3] : memref<1x32xf32, #tpu.memory_space<vmem>>, vector<1x32xf32>
    %c0_4 = arith.constant 0 : index
    %c0_5 = arith.constant 0 : index
    %3 = vector.load %arg12[%c0_4, %c0_5] : memref<1x32xf32, #tpu.memory_space<vmem>>, vector<1x32xf32>
    %cst = arith.constant dense<0.000000e+00> : vector<8xf32>
    %4 = vector.multi_reduction <add>, %1, %cst [1] : vector<8x32xf32> to vector<8xf32>
    %5 = vector.shape_cast %4 : vector<8xf32> to vector<8x1xf32>
    %cst_6 = arith.constant 3.200000e+01 : f32
    %6 = vector.broadcast %cst_6 : f32 to vector<8x1xf32>
    %7 = arith.divf %5, %6 : vector<8x1xf32>
    %8 = vector.broadcast %7 : vector<8x1xf32> to vector<8x32xf32>
    %9 = arith.subf %1, %8 : vector<8x32xf32>
    %10 = arith.mulf %9, %9 : vector<8x32xf32>
    %cst_7 = arith.constant dense<0.000000e+00> : vector<8xf32>
    %11 = vector.multi_reduction <add>, %10, %cst_7 [1] : vector<8x32xf32> to vector<8xf32>
    %12 = vector.shape_cast %11 : vector<8xf32> to vector<8x1xf32>
    %cst_8 = arith.constant 3.200000e+01 : f32
    %13 = vector.broadcast %cst_8 : f32 to vector<8x1xf32>
    %14 = arith.divf %12, %13 : vector<8x1xf32>
    %cst_9 = arith.constant 9.99999997E-7 : f32
    %15 = vector.broadcast %cst_9 : f32 to vector<8x1xf32>
    %16 = arith.addf %14, %15 : vector<8x1xf32>
    %17 = math.rsqrt %16 : vector<8x1xf32>
    %18 = vector.broadcast %17 : vector<8x1xf32> to vector<8x32xf32>
    %19 = arith.mulf %9, %18 : vector<8x32xf32>
    %20 = vector.broadcast %2 : vector<1x32xf32> to vector<8x32xf32>
    %21 = arith.mulf %19, %20 : vector<8x32xf32>
    %22 = vector.broadcast %3 : vector<1x32xf32> to vector<8x32xf32>
    %23 = arith.addf %21, %22 : vector<8x32xf32>
    %c0_10 = arith.constant 0 : index
    %c0_11 = arith.constant 0 : index
    %24 = vector.load %arg3[%c0_10, %c0_11] : memref<32x32xf32, #tpu.memory_space<vmem>>, vector<32x32xf32>
    %cst_12 = arith.constant dense<0.000000e+00> : vector<8x32xf32>
    %25 = tpu.matmul %23, %24, %cst_12 {dimension_numbers = #tpu.dot_dimension_numbers<[1], [0], [0], [1], [0, 0, 1, 1], [], []>} : vector<8x32xf32>, vector<32x32xf32>, vector<8x32xf32> -> vector<8x32xf32>
    %c0_13 = arith.constant 0 : index
    %c0_14 = arith.constant 0 : index
    %26 = vector.load %arg4[%c0_13, %c0_14] : memref<1x32xf32, #tpu.memory_space<vmem>>, vector<1x32xf32>
    %27 = vector.broadcast %26 : vector<1x32xf32> to vector<8x32xf32>
    %28 = arith.addf %25, %27 : vector<8x32xf32>
    %c0_15 = arith.constant 0 : index
    %c0_16 = arith.constant 0 : index
    %29 = vector.load %arg5[%c0_15, %c0_16] : memref<32x32xf32, #tpu.memory_space<vmem>>, vector<32x32xf32>
    %cst_17 = arith.constant dense<0.000000e+00> : vector<8x32xf32>
    %30 = tpu.matmul %23, %29, %cst_17 {dimension_numbers = #tpu.dot_dimension_numbers<[1], [0], [0], [1], [0, 0, 1, 1], [], []>} : vector<8x32xf32>, vector<32x32xf32>, vector<8x32xf32> -> vector<8x32xf32>
    %c0_18 = arith.constant 0 : index
    %c0_19 = arith.constant 0 : index
    %31 = vector.load %arg6[%c0_18, %c0_19] : memref<1x32xf32, #tpu.memory_space<vmem>>, vector<1x32xf32>
    %32 = vector.broadcast %31 : vector<1x32xf32> to vector<8x32xf32>
    %33 = arith.addf %30, %32 : vector<8x32xf32>
    %c0_20 = arith.constant 0 : index
    %c0_21 = arith.constant 0 : index
    %34 = vector.load %arg7[%c0_20, %c0_21] : memref<32x32xf32, #tpu.memory_space<vmem>>, vector<32x32xf32>
    %cst_22 = arith.constant dense<0.000000e+00> : vector<8x32xf32>
    %35 = tpu.matmul %23, %34, %cst_22 {dimension_numbers = #tpu.dot_dimension_numbers<[1], [0], [0], [1], [0, 0, 1, 1], [], []>} : vector<8x32xf32>, vector<32x32xf32>, vector<8x32xf32> -> vector<8x32xf32>
    %c0_23 = arith.constant 0 : index
    %c0_24 = arith.constant 0 : index
    %36 = vector.load %arg8[%c0_23, %c0_24] : memref<1x32xf32, #tpu.memory_space<vmem>>, vector<1x32xf32>
    %37 = vector.broadcast %36 : vector<1x32xf32> to vector<8x32xf32>
    %38 = arith.addf %35, %37 : vector<8x32xf32>
    %39 = vector.extract_strided_slice %28 {offsets = [0, 0], sizes = [8, 8], strides = [1, 1]} : vector<8x32xf32> to vector<8x8xf32>
    %40 = vector.extract_strided_slice %33 {offsets = [0, 0], sizes = [8, 8], strides = [1, 1]} : vector<8x32xf32> to vector<8x8xf32>
    %41 = vector.extract_strided_slice %38 {offsets = [0, 0], sizes = [8, 8], strides = [1, 1]} : vector<8x32xf32> to vector<8x8xf32>
    %cst_25 = arith.constant dense<0.000000e+00> : vector<8x8xf32>
    %42 = tpu.matmul %39, %40, %cst_25 {dimension_numbers = #tpu.dot_dimension_numbers<[1], [1], [0], [0], [0, 0, 1, 0], [], []>} : vector<8x8xf32>, vector<8x8xf32>, vector<8x8xf32> -> vector<8x8xf32>
    %cst_26 = arith.constant dense<0xFF800000> : vector<8xf32>
    %43 = vector.multi_reduction <maximumf>, %42, %cst_26 [1] : vector<8x8xf32> to vector<8xf32>
    %44 = vector.shape_cast %43 : vector<8xf32> to vector<8x1xf32>
    %45 = vector.broadcast %44 : vector<8x1xf32> to vector<8x8xf32>
    %46 = arith.subf %42, %45 : vector<8x8xf32>
    %47 = math.exp %46 : vector<8x8xf32>
    %cst_27 = arith.constant dense<0.000000e+00> : vector<8xf32>
    %48 = vector.multi_reduction <add>, %47, %cst_27 [1] : vector<8x8xf32> to vector<8xf32>
    %49 = vector.shape_cast %48 : vector<8xf32> to vector<8x1xf32>
    %50 = tpu.reciprocal %49 {approx = true} : vector<8x1xf32> -> vector<8x1xf32>
    %51 = vector.broadcast %50 : vector<8x1xf32> to vector<8x8xf32>
    %52 = arith.mulf %47, %51 : vector<8x8xf32>
    %cst_28 = arith.constant dense<0.000000e+00> : vector<8x8xf32>
    %53 = tpu.matmul %52, %41, %cst_28 {dimension_numbers = #tpu.dot_dimension_numbers<[1], [0], [0], [1], [0, 0, 1, 1], [], []>} : vector<8x8xf32>, vector<8x8xf32>, vector<8x8xf32> -> vector<8x8xf32>
    %54 = vector.extract_strided_slice %28 {offsets = [0, 8], sizes = [8, 8], strides = [1, 1]} : vector<8x32xf32> to vector<8x8xf32>
    %55 = vector.extract_strided_slice %33 {offsets = [0, 8], sizes = [8, 8], strides = [1, 1]} : vector<8x32xf32> to vector<8x8xf32>
    %56 = vector.extract_strided_slice %38 {offsets = [0, 8], sizes = [8, 8], strides = [1, 1]} : vector<8x32xf32> to vector<8x8xf32>
    %cst_29 = arith.constant dense<0.000000e+00> : vector<8x8xf32>
    %57 = tpu.matmul %54, %55, %cst_29 {dimension_numbers = #tpu.dot_dimension_numbers<[1], [1], [0], [0], [0, 0, 1, 0], [], []>} : vector<8x8xf32>, vector<8x8xf32>, vector<8x8xf32> -> vector<8x8xf32>
    %cst_30 = arith.constant dense<0xFF800000> : vector<8xf32>
    %58 = vector.multi_reduction <maximumf>, %57, %cst_30 [1] : vector<8x8xf32> to vector<8xf32>
    %59 = vector.shape_cast %58 : vector<8xf32> to vector<8x1xf32>
    %60 = vector.broadcast %59 : vector<8x1xf32> to vector<8x8xf32>
    %61 = arith.subf %57, %60 : vector<8x8xf32>
    %62 = math.exp %61 : vector<8x8xf32>
    %cst_31 = arith.constant dense<0.000000e+00> : vector<8xf32>
    %63 = vector.multi_reduction <add>, %62, %cst_31 [1] : vector<8x8xf32> to vector<8xf32>
    %64 = vector.shape_cast %63 : vector<8xf32> to vector<8x1xf32>
    %65 = tpu.reciprocal %64 {approx = true} : vector<8x1xf32> -> vector<8x1xf32>
    %66 = vector.broadcast %65 : vector<8x1xf32> to vector<8x8xf32>
    %67 = arith.mulf %62, %66 : vector<8x8xf32>
    %cst_32 = arith.constant dense<0.000000e+00> : vector<8x8xf32>
    %68 = tpu.matmul %67, %56, %cst_32 {dimension_numbers = #tpu.dot_dimension_numbers<[1], [0], [0], [1], [0, 0, 1, 1], [], []>} : vector<8x8xf32>, vector<8x8xf32>, vector<8x8xf32> -> vector<8x8xf32>
    %69 = vector.extract_strided_slice %28 {offsets = [0, 16], sizes = [8, 8], strides = [1, 1]} : vector<8x32xf32> to vector<8x8xf32>
    %70 = vector.extract_strided_slice %33 {offsets = [0, 16], sizes = [8, 8], strides = [1, 1]} : vector<8x32xf32> to vector<8x8xf32>
    %71 = vector.extract_strided_slice %38 {offsets = [0, 16], sizes = [8, 8], strides = [1, 1]} : vector<8x32xf32> to vector<8x8xf32>
    %cst_33 = arith.constant dense<0.000000e+00> : vector<8x8xf32>
    %72 = tpu.matmul %69, %70, %cst_33 {dimension_numbers = #tpu.dot_dimension_numbers<[1], [1], [0], [0], [0, 0, 1, 0], [], []>} : vector<8x8xf32>, vector<8x8xf32>, vector<8x8xf32> -> vector<8x8xf32>
    %cst_34 = arith.constant dense<0xFF800000> : vector<8xf32>
    %73 = vector.multi_reduction <maximumf>, %72, %cst_34 [1] : vector<8x8xf32> to vector<8xf32>
    %74 = vector.shape_cast %73 : vector<8xf32> to vector<8x1xf32>
    %75 = vector.broadcast %74 : vector<8x1xf32> to vector<8x8xf32>
    %76 = arith.subf %72, %75 : vector<8x8xf32>
    %77 = math.exp %76 : vector<8x8xf32>
    %cst_35 = arith.constant dense<0.000000e+00> : vector<8xf32>
    %78 = vector.multi_reduction <add>, %77, %cst_35 [1] : vector<8x8xf32> to vector<8xf32>
    %79 = vector.shape_cast %78 : vector<8xf32> to vector<8x1xf32>
    %80 = tpu.reciprocal %79 {approx = true} : vector<8x1xf32> -> vector<8x1xf32>
    %81 = vector.broadcast %80 : vector<8x1xf32> to vector<8x8xf32>
    %82 = arith.mulf %77, %81 : vector<8x8xf32>
    %cst_36 = arith.constant dense<0.000000e+00> : vector<8x8xf32>
    %83 = tpu.matmul %82, %71, %cst_36 {dimension_numbers = #tpu.dot_dimension_numbers<[1], [0], [0], [1], [0, 0, 1, 1], [], []>} : vector<8x8xf32>, vector<8x8xf32>, vector<8x8xf32> -> vector<8x8xf32>
    %84 = vector.extract_strided_slice %28 {offsets = [0, 24], sizes = [8, 8], strides = [1, 1]} : vector<8x32xf32> to vector<8x8xf32>
    %85 = vector.extract_strided_slice %33 {offsets = [0, 24], sizes = [8, 8], strides = [1, 1]} : vector<8x32xf32> to vector<8x8xf32>
    %86 = vector.extract_strided_slice %38 {offsets = [0, 24], sizes = [8, 8], strides = [1, 1]} : vector<8x32xf32> to vector<8x8xf32>
    %cst_37 = arith.constant dense<0.000000e+00> : vector<8x8xf32>
    %87 = tpu.matmul %84, %85, %cst_37 {dimension_numbers = #tpu.dot_dimension_numbers<[1], [1], [0], [0], [0, 0, 1, 0], [], []>} : vector<8x8xf32>, vector<8x8xf32>, vector<8x8xf32> -> vector<8x8xf32>
    %cst_38 = arith.constant dense<0xFF800000> : vector<8xf32>
    %88 = vector.multi_reduction <maximumf>, %87, %cst_38 [1] : vector<8x8xf32> to vector<8xf32>
    %89 = vector.shape_cast %88 : vector<8xf32> to vector<8x1xf32>
    %90 = vector.broadcast %89 : vector<8x1xf32> to vector<8x8xf32>
    %91 = arith.subf %87, %90 : vector<8x8xf32>
    %92 = math.exp %91 : vector<8x8xf32>
    %cst_39 = arith.constant dense<0.000000e+00> : vector<8xf32>
    %93 = vector.multi_reduction <add>, %92, %cst_39 [1] : vector<8x8xf32> to vector<8xf32>
    %94 = vector.shape_cast %93 : vector<8xf32> to vector<8x1xf32>
    %95 = tpu.reciprocal %94 {approx = true} : vector<8x1xf32> -> vector<8x1xf32>
    %96 = vector.broadcast %95 : vector<8x1xf32> to vector<8x8xf32>
    %97 = arith.mulf %92, %96 : vector<8x8xf32>
    %cst_40 = arith.constant dense<0.000000e+00> : vector<8x8xf32>
    %98 = tpu.matmul %97, %86, %cst_40 {dimension_numbers = #tpu.dot_dimension_numbers<[1], [0], [0], [1], [0, 0, 1, 1], [], []>} : vector<8x8xf32>, vector<8x8xf32>, vector<8x8xf32> -> vector<8x8xf32>
    %99 = tpu.concatenate %53, %68, %83, %98 in 1 : vector<8x8xf32>, vector<8x8xf32>, vector<8x8xf32>, vector<8x8xf32> -> vector<8x32xf32>
    %c0_41 = arith.constant 0 : index
    %c0_42 = arith.constant 0 : index
    %100 = vector.load %arg9[%c0_41, %c0_42] : memref<32x32xf32, #tpu.memory_space<vmem>>, vector<32x32xf32>
    %cst_43 = arith.constant dense<0.000000e+00> : vector<8x32xf32>
    %101 = tpu.matmul %99, %100, %cst_43 {dimension_numbers = #tpu.dot_dimension_numbers<[1], [0], [0], [1], [0, 0, 1, 1], [], []>} : vector<8x32xf32>, vector<32x32xf32>, vector<8x32xf32> -> vector<8x32xf32>
    %c0_44 = arith.constant 0 : index
    %c0_45 = arith.constant 0 : index
    %102 = vector.load %arg10[%c0_44, %c0_45] : memref<1x32xf32, #tpu.memory_space<vmem>>, vector<1x32xf32>
    %103 = vector.broadcast %102 : vector<1x32xf32> to vector<8x32xf32>
    %104 = arith.addf %101, %103 : vector<8x32xf32>
    %105 = arith.addf %1, %104 : vector<8x32xf32>
    %c0_46 = arith.constant 0 : index
    %c0_47 = arith.constant 0 : index
    %106 = vector.load %arg13[%c0_46, %c0_47] : memref<1x32xf32, #tpu.memory_space<vmem>>, vector<1x32xf32>
    %c0_48 = arith.constant 0 : index
    %c0_49 = arith.constant 0 : index
    %107 = vector.load %arg14[%c0_48, %c0_49] : memref<1x32xf32, #tpu.memory_space<vmem>>, vector<1x32xf32>
    %cst_50 = arith.constant dense<0.000000e+00> : vector<8xf32>
    %108 = vector.multi_reduction <add>, %105, %cst_50 [1] : vector<8x32xf32> to vector<8xf32>
    %109 = vector.shape_cast %108 : vector<8xf32> to vector<8x1xf32>
    %cst_51 = arith.constant 3.200000e+01 : f32
    %110 = vector.broadcast %cst_51 : f32 to vector<8x1xf32>
    %111 = arith.divf %109, %110 : vector<8x1xf32>
    %112 = vector.broadcast %111 : vector<8x1xf32> to vector<8x32xf32>
    %113 = arith.subf %105, %112 : vector<8x32xf32>
    %114 = arith.mulf %113, %113 : vector<8x32xf32>
    %cst_52 = arith.constant dense<0.000000e+00> : vector<8xf32>
    %115 = vector.multi_reduction <add>, %114, %cst_52 [1] : vector<8x32xf32> to vector<8xf32>
    %116 = vector.shape_cast %115 : vector<8xf32> to vector<8x1xf32>
    %cst_53 = arith.constant 3.200000e+01 : f32
    %117 = vector.broadcast %cst_53 : f32 to vector<8x1xf32>
    %118 = arith.divf %116, %117 : vector<8x1xf32>
    %cst_54 = arith.constant 9.99999997E-7 : f32
    %119 = vector.broadcast %cst_54 : f32 to vector<8x1xf32>
    %120 = arith.addf %118, %119 : vector<8x1xf32>
    %121 = math.rsqrt %120 : vector<8x1xf32>
    %122 = vector.broadcast %121 : vector<8x1xf32> to vector<8x32xf32>
    %123 = arith.mulf %113, %122 : vector<8x32xf32>
    %124 = vector.broadcast %106 : vector<1x32xf32> to vector<8x32xf32>
    %125 = arith.mulf %123, %124 : vector<8x32xf32>
    %126 = vector.broadcast %107 : vector<1x32xf32> to vector<8x32xf32>
    %127 = arith.addf %125, %126 : vector<8x32xf32>
    %c0_55 = arith.constant 0 : index
    %c0_56 = arith.constant 0 : index
    %128 = vector.load %arg15[%c0_55, %c0_56] : memref<32x64xf32, #tpu.memory_space<vmem>>, vector<32x64xf32>
    %cst_57 = arith.constant dense<0.000000e+00> : vector<8x64xf32>
    %129 = tpu.matmul %127, %128, %cst_57 {dimension_numbers = #tpu.dot_dimension_numbers<[1], [0], [0], [1], [0, 0, 1, 1], [], []>} : vector<8x32xf32>, vector<32x64xf32>, vector<8x64xf32> -> vector<8x64xf32>
    %c0_58 = arith.constant 0 : index
    %c0_59 = arith.constant 0 : index
    %130 = vector.load %arg16[%c0_58, %c0_59] : memref<1x64xf32, #tpu.memory_space<vmem>>, vector<1x64xf32>
    %131 = vector.broadcast %130 : vector<1x64xf32> to vector<8x64xf32>
    %132 = arith.addf %129, %131 : vector<8x64xf32>
    %133 = arith.mulf %132, %132 : vector<8x64xf32>
    %134 = arith.mulf %132, %133 : vector<8x64xf32>
    %cst_60 = arith.constant 4.471500e-02 : f32
    %135 = vector.broadcast %cst_60 : f32 to vector<8x64xf32>
    %136 = arith.mulf %135, %134 : vector<8x64xf32>
    %137 = arith.addf %132, %136 : vector<8x64xf32>
    %cst_61 = arith.constant 0.797884583 : f32
    %138 = vector.broadcast %cst_61 : f32 to vector<8x64xf32>
    %139 = arith.mulf %138, %137 : vector<8x64xf32>
    %140 = math.tanh %139 : vector<8x64xf32>
    %cst_62 = arith.constant 1.000000e+00 : f32
    %141 = vector.broadcast %cst_62 : f32 to vector<8x64xf32>
    %142 = arith.addf %141, %140 : vector<8x64xf32>
    %cst_63 = arith.constant 5.000000e-01 : f32
    %143 = vector.broadcast %cst_63 : f32 to vector<8x64xf32>
    %144 = arith.mulf %143, %142 : vector<8x64xf32>
    %145 = arith.mulf %132, %144 : vector<8x64xf32>
    %c0_64 = arith.constant 0 : index
    %c0_65 = arith.constant 0 : index
    %146 = vector.load %arg17[%c0_64, %c0_65] : memref<64x32xf32, #tpu.memory_space<vmem>>, vector<64x32xf32>
    %cst_66 = arith.constant dense<0.000000e+00> : vector<8x32xf32>
    %147 = tpu.matmul %145, %146, %cst_66 {dimension_numbers = #tpu.dot_dimension_numbers<[1], [0], [0], [1], [0, 0, 1, 1], [], []>} : vector<8x64xf32>, vector<64x32xf32>, vector<8x32xf32> -> vector<8x32xf32>
    %c0_67 = arith.constant 0 : index
    %c0_68 = arith.constant 0 : index
    %148 = vector.load %arg18[%c0_67, %c0_68] : memref<1x32xf32, #tpu.memory_space<vmem>>, vector<1x32xf32>
    %149 = vector.broadcast %148 : vector<1x32xf32> to vector<8x32xf32>
    %150 = arith.addf %147, %149 : vector<8x32xf32>
    %151 = arith.addf %105, %150 : vector<8x32xf32>
    %c0_69 = arith.constant 0 : index
    %c0_70 = arith.constant 0 : index
    %c0_71 = arith.constant 0 : index
    %152 = vector.load %arg21[%c0_69, %c0_70, %c0_71] : memref<1x8x32xf32, #tpu.memory_space<vmem>>, vector<1x8x32xf32>
    %153 = vector.shape_cast %152 : vector<1x8x32xf32> to vector<8x32xf32>
    %154 = vector.shape_cast %151 : vector<8x32xf32> to vector<1x8x32xf32>
    tpu.vector_store %arg21[%c0_69, %c0_70, %c0_71], %154 {strides = array<i32>} : memref<1x8x32xf32, #tpu.memory_space<vmem>>, vector<1x8x32xf32>,
    return
  }
  func.func @transform_0(%arg0: i32, %arg1: i32) -> (i32, i32, i32) {
    %c0_i32 = arith.constant 0 : i32
    %c0_i32_0 = arith.constant 0 : i32
    %c0_i32_1 = arith.constant 0 : i32
    return %arg0, %c0_i32, %c0_i32_0 : i32, i32, i32
  }
  func.func @transform_1(%arg0: i32, %arg1: i32) -> (i32, i32) {
    %c0_i32 = arith.constant 0 : i32
    %c0_i32_0 = arith.constant 0 : i32
    %c0_i32_1 = arith.constant 0 : i32
    return %c0_i32, %c0_i32_0 : i32, i32
  }
  func.func @transform_2(%arg0: i32, %arg1: i32) -> (i32, i32) {
    %c0_i32 = arith.constant 0 : i32
    %c0_i32_0 = arith.constant 0 : i32
    %c0_i32_1 = arith.constant 0 : i32
    return %c0_i32, %c0_i32_0 : i32, i32
  }
  func.func @transform_3(%arg0: i32, %arg1: i32) -> (i32, i32) {
    %c0_i32 = arith.constant 0 : i32
    %c0_i32_0 = arith.constant 0 : i32
    %c0_i32_1 = arith.constant 0 : i32
    return %c0_i32, %c0_i32_0 : i32, i32
  }
  func.func @transform_4(%arg0: i32, %arg1: i32) -> (i32, i32) {
    %c0_i32 = arith.constant 0 : i32
    %c0_i32_0 = arith.constant 0 : i32
    %c0_i32_1 = arith.constant 0 : i32
    return %c0_i32, %c0_i32_0 : i32, i32
  }
  func.func @transform_5(%arg0: i32, %arg1: i32) -> (i32, i32) {
    %c0_i32 = arith.constant 0 : i32
    %c0_i32_0 = arith.constant 0 : i32
    %c0_i32_1 = arith.constant 0 : i32
    return %c0_i32, %c0_i32_0 : i32, i32
  }
  func.func @transform_6(%arg0: i32, %arg1: i32) -> (i32, i32) {
    %c0_i32 = arith.constant 0 : i32
    %c0_i32_0 = arith.constant 0 : i32
    %c0_i32_1 = arith.constant 0 : i32
    return %c0_i32, %c0_i32_0 : i32, i32
  }
  func.func @transform_7(%arg0: i32, %arg1: i32) -> (i32, i32) {
    %c0_i32 = arith.constant 0 : i32
    %c0_i32_0 = arith.constant 0 : i32
    %c0_i32_1 = arith.constant 0 : i32
    return %c0_i32, %c0_i32_0 : i32, i32
  }
  func.func @transform_8(%arg0: i32, %arg1: i32) -> (i32, i32) {
    %c0_i32 = arith.constant 0 : i32
    %c0_i32_0 = arith.constant 0 : i32
    %c0_i32_1 = arith.constant 0 : i32
    return %c0_i32, %c0_i32_0 : i32, i32
  }
  func.func @transform_9(%arg0: i32, %arg1: i32) -> (i32, i32) {
    %c0_i32 = arith.constant 0 : i32
    %c0_i32_0 = arith.constant 0 : i32
    %c0_i32_1 = arith.constant 0 : i32
    return %c0_i32, %c0_i32_0 : i32, i32
  }
  func.func @transform_10(%arg0: i32, %arg1: i32) -> (i32, i32) {
    %c0_i32 = arith.constant 0 : i32
    %c0_i32_0 = arith.constant 0 : i32
    %c0_i32_1 = arith.constant 0 : i32
    return %c0_i32, %c0_i32_0 : i32, i32
  }
  func.func @transform_11(%arg0: i32, %arg1: i32) -> (i32, i32) {
    %c0_i32 = arith.constant 0 : i32
    %c0_i32_0 = arith.constant 0 : i32
    %c0_i32_1 = arith.constant 0 : i32
    return %c0_i32, %c0_i32_0 : i32, i32
  }
  func.func @transform_12(%arg0: i32, %arg1: i32) -> (i32, i32) {
    %c0_i32 = arith.constant 0 : i32
    %c0_i32_0 = arith.constant 0 : i32
    %c0_i32_1 = arith.constant 0 : i32
    return %c0_i32, %c0_i32_0 : i32, i32
  }
  func.func @transform_13(%arg0: i32, %arg1: i32) -> (i32, i32) {
    %c0_i32 = arith.constant 0 : i32
    %c0_i32_0 = arith.constant 0 : i32
    %c0_i32_1 = arith.constant 0 : i32
    return %c0_i32, %c0_i32_0 : i32, i32
  }
  func.func @transform_14(%arg0: i32, %arg1: i32) -> (i32, i32) {
    %c0_i32 = arith.constant 0 : i32
    %c0_i32_0 = arith.constant 0 : i32
    %c0_i32_1 = arith.constant 0 : i32
    return %c0_i32, %c0_i32_0 : i32, i32
  }
  func.func @transform_15(%arg0: i32, %arg1: i32) -> (i32, i32) {
    %c0_i32 = arith.constant 0 : i32
    %c0_i32_0 = arith.constant 0 : i32
    %c0_i32_1 = arith.constant 0 : i32
    return %c0_i32, %c0_i32_0 : i32, i32
  }
  func.func @transform_16(%arg0: i32, %arg1: i32) -> (i32, i32) {
    %c0_i32 = arith.constant 0 : i32
    %c0_i32_0 = arith.constant 0 : i32
    %c0_i32_1 = arith.constant 0 : i32
    return %c0_i32, %c0_i32_0 : i32, i32
  }
  func.func @transform_17(%arg0: i32, %arg1: i32) -> (i32, i32) {
    %c0_i32 = arith.constant 0 : i32
    %c0_i32_0 = arith.constant 0 : i32
    %c0_i32_1 = arith.constant 0 : i32
    return %c0_i32, %c0_i32_0 : i32, i32
  }
  func.func @transform_18(%arg0: i32, %arg1: i32) -> (i32, i32) {
    %c0_i32 = arith.constant 0 : i32
    %c0_i32_0 = arith.constant 0 : i32
    %c0_i32_1 = arith.constant 0 : i32
    return %c0_i32, %c0_i32_0 : i32, i32
  }
  func.func @transform_19(%arg0: i32, %arg1: i32) -> (i32, i32, i32) {
    %c0_i32 = arith.constant 0 : i32
    %c0_i32_0 = arith.constant 0 : i32
    return %arg0, %arg1, %c0_i32 : i32, i32, i32
  }
}

</mosaic_0001>

<bundles_post_ra>
// kernel: tpu_custom_call.1
= control target key start
LH: loop header
LB: loop body
LE: loop exit
PB: predicated region body
PF: predicated region fallthrough
CT: control target
= control target key end

     0   :  { %s3130_s0 = inlined_call_operand.hbm [shape: f32[2,8,32], index: 0, kind: input, shape index: {}]   ;;  %s3131_s1 = inlined_call_operand.vmem [shape: f32[32,32], index: 1, kind: input, shape index: {}]   ;;  %s3132_s2 = inlined_call_operand.vmem [shape: f32[1,32], index: 2, kind: input, shape index: {}]   ;;  %s3133_s3 = inlined_call_operand.vmem [shape: f32[32,32], index: 3, kind: input, shape index: {}]   ;;  %s3134_s4 = inlined_call_operand.vmem [shape: f32[1,32], index: 4, kind: input, shape index: {}]   ;;  %s3135_s5 = inlined_call_operand.vmem [shape: f32[32,32], index: 5, kind: input, shape index: {}]   ;;  %s3136_s6 = inlined_call_operand.vmem [shape: f32[1,32], index: 6, kind: input, shape index: {}]   ;;  %s3137_s7 = inlined_call_operand.hbm [shape: f32[32,32], index: 7, kind: input, shape index: {}]   ;;  %s3138_s8 = inlined_call_operand.vmem [shape: f32[1,32], index: 8, kind: input, shape index: {}]   ;;  %s3139_s9 = inlined_call_operand.vmem [shape: f32[1,32], index: 9, kind: input, shape index: {}]   ;;  %s3140_s10 = inlined_call_operand.vmem [shape: f32[1,32], index: 10, kind: input, shape index: {}]   ;;  %s3141_s11 = inlined_call_operand.vmem [shape: f32[1,32], index: 11, kind: input, shape index: {}]   ;;  %s3142_s12 = inlined_call_operand.vmem [shape: f32[1,32], index: 12, kind: input, shape index: {}]   ;;  %s3143_s13 = inlined_call_operand.hbm [shape: f32[32,64], index: 13, kind: input, shape index: {}]   ;;  %s3144_s14 = inlined_call_operand.vmem [shape: f32[1,64], index: 14, kind: input, shape index: {}]   ;;  %s3145_s15 = inlined_call_operand.vmem [shape: f32[64,32], index: 15, kind: input, shape index: {}]   ;;  %s3146_s16 = inlined_call_operand.vmem [shape: f32[1,32], index: 16, kind: input, shape index: {}]   ;;  %s3147_s17 = inlined_call_operand.vmem [shape: f32[1,32], index: 17, kind: input, shape index: {}]   ;;  %s3148_s18 = inlined_call_operand.vmem [shape: f32[1,32], index: 18, kind: input, shape index: {}]   ;;  %s3149_s19 = inlined_call_operand.hbm [shape: f32[2,8,32], index: 19, kind: output, shape index: {}]  }
   0x1   :  { %3161 = sst [smem:[#allocation15_spill]] %s3130_s0 }
   0x2   :  { %3162 = sst [smem:[#allocation16_spill]] %s3131_s1 }
   0x3   :  { %3163 = sst [smem:[#allocation17_spill]] %s3132_s2 }
   0x4   :  { %3164 = sst [smem:[#allocation18_spill]] %s3133_s3 }
   0x5   :  { %3165 = sst [smem:[#allocation19_spill]] %s3134_s4 }
   0x6   :  { %3166 = sst [smem:[#allocation20_spill]] %s3135_s5 }
   0x7   :  { %3167 = sst [smem:[#allocation21_spill]] %s3142_s12 }
   0x8   :  { %3168 = sst [smem:[#allocation22_spill]] %s3144_s14 }
   0x9   :  { %3169 = sst [smem:[#allocation23_spill]] %s3145_s15 }
   0xa   :  { %3170 = sst [smem:[#allocation24_spill]] %s3146_s16 }
   0xb   :  { %3171 = sst [smem:[#allocation25_spill]] %s3149_s19 }
   0xc   :  { %24 = vsyncpa [#allocation3], 0 }
   0xd   :  { %26 = vsyncpa [#allocation3 + $0x1], 0 }
   0xe   :  { %27 = vsyncpa [#allocation6], 0 }
   0xf   :  { %28 = vsyncpa [#allocation4], 0 }
  0x10   :  { %30 = vsyncpa [#allocation4 + $0x1], 0  ;;  %s2680_s0 = smov 0   ;;  %s2682_s30 = smov 0  }
  0x11   :  { %s2684_s20 = smov 0   ;;  %s2686_s21 = smov 0  }
  0x12   :  { %s2688_s17 = smov 0   ;;  %s2690_s1 = smov 0  }
  0x13 LB: > { %3172 = sst [smem:[#allocation12_spill]] %s2543_s0  ;;  %s2024_s18 = sadd.s32 4294967295, %s2563_s1   ;;  %s2563_s1 = sphi %s2690_s1, %s36_s1   ;;  %s2559_s17 = sphi %s2688_s17, %s3206_s17   ;;  %s2555_s21 = sphi %s2686_s21, %s3205_s21   ;;  %s2551_s20 = sphi %s2684_s20, %s3204_s20   ;;  %s2547_s30 = sphi %s2682_s30, %s3203_s30   ;;  %s2543_s0 = sphi %s2680_s0, %s3202_s0  }
  0x14   : > { %3173 = sst [smem:[#allocation13_spill]] %s2555_s21  ;;  %s2025_s22 = sadd.s32 4294967294, %s2563_s1  }
  0x15   : > { %p68_p0 = scmp.ne.s32.totalorder %s2547_s30, %s2543_s0  ;;  %p2714_p1 = scmp.eq.s32.totalorder %s2024_s18, 0 }
  0x16   : > { %p2718_p2 = scmp.eq.s32.totalorder %s2024_s18, 1  ;;  %p478_p3 = scmp.eq.s32.totalorder %s2025_s22, 1 }
  0x17   : > { %s3174_s2 = scalar_select %p2714_p1, 1, 0 }
  0x18   : > { %p2724_p4 = por %p2714_p1, %p68_p0  ;;  %p2026_p5 = scmp.ge.s32.totalorder %s2563_s1, 1 }
  0x19   : > { %p2729_p6 = por %p478_p3, %p68_p0  ;;  %p485_p7 = scmp.lt.s32.totalorder %s2563_s1, 3 }
  0x1a   : > { %s3176_s24 = scalar_select %p2724_p4, 1, 0 }
  0x1b   : > { %s3177_s25 = scalar_select %p2729_p6, 1, 0 }
  0x1c   : > { %p2734_p8 = pnand %p2026_p5, %p485_p7  ;;  %s2565_s26 = smov [#allocation5]  }
  0x1d   : > { %3178 = sst [smem:[#allocation14_spill]] %s3177_s25  ;;  %s515_s27 = sshll.u32 %s2565_s26, 4  ;;  %s2738_s27 = int_to_ptr.vmem [resolvable:$true] %s515_s27 }
  0x1e   : > { %p2287_p9 = pneg %p2734_p8  ;;  %s2566_s29 = smov [#allocation7]  }
  0x1f   : > { %s543_s18 = sshll.u32 %s2566_s29, 4  ;;  %s2391_s26 = scalar_lea.hbm %s3137_s7, 512  ;;  %s2749_s18 = int_to_ptr.vmem [resolvable:$true] %s543_s18 }
  0x20   : > { %p2745_p11 = pnand %p2287_p9, %p2714_p1  ;;  %p2392_p12 = scmp.ne.s32.totalorder %s3137_s7, %s2391_s26 }
  0x21   : > { %p2398_p5 = scmp.lt.u32.totalorder %s2391_s26, %s3137_s7 }
  0x22   : > { %p2393_p13 = pneg %p2745_p11 }
  0x24   : > { %p2394_p0 = pnand %p2393_p13, %p2392_p12 }
  0x26   : > { %p2395_p3 = pneg %p2394_p0 }
  0x28   : > { %p2400_p7 = pnand %p2398_p5, %p2395_p3 }
  0x2a   : > { %2403 = shalt.err (!%p2400_p7)
}
  0x2b   : > { %s2404_s25 = scalar_lea.vmem %s2738_s27, 512  ;;  %p2412_p1 = scmp.lt.s32.totalorder %s2738_s27, %s2738_s27 }
  0x2c   : > { %p2405_p9 = scmp.ne.s32.totalorder %s2738_s27, %s2404_s25  ;;  %p2413_p12 = scmp.lt.s32.totalorder %s2404_s25, %s2404_s25 }
  0x2e   : > { %p2407_p10 = pnand %p2405_p9, %p2393_p13  ;;  %p2414_p0 = por %p2413_p12, %p2412_p1 }
  0x30   : > { %p2408_p6 = pneg %p2407_p10 }
  0x32   : > { %p2415_p4 = pnand %p2414_p0, %p2408_p6 }
  0x34   : > { %2418 = shalt.err (!%p2415_p4)
}
  0x35   : > { %s2567_s16 = smov 128   ;;  %s2568_s19 = smov 8  }
  0x36   : > { %2290 = dma.hbm_to_vmem [thread:$0]  (!%p2745_p11), %s3137_s7, 512, %s2738_s27, [#allocation6], %s2567_s16, %s2567_s16, %s2568_s19  }
  0x37   : > { %s2419_s26 = scalar_lea.hbm %s3143_s13, 512 }
  0x38   : > { %p2420_p1 = scmp.ne.s32.totalorder %s3143_s13, %s2419_s26  ;;  %p2426_p10 = scmp.lt.u32.totalorder %s2419_s26, %s3143_s13 }
  0x3a   : > { %p2422_p4 = pnand %p2420_p1, %p2393_p13 }
  0x3c   : > { %p2423_p6 = pneg %p2422_p4 }
  0x3e   : > { %p2428_p3 = pnand %p2426_p10, %p2423_p6 }
  0x40   : > { %2431 = shalt.err (!%p2428_p3)
}
  0x41   : > { %s2432_s27 = scalar_lea.vmem %s2749_s18, 512  ;;  %p2440_p12 = scmp.lt.s32.totalorder %s2749_s18, %s2749_s18 }
  0x42   : > { %p2433_p5 = scmp.ne.s32.totalorder %s2749_s18, %s2432_s27  ;;  %p2441_p0 = scmp.lt.s32.totalorder %s2432_s27, %s2432_s27 }
  0x44   : > { %p2435_p7 = pnand %p2433_p5, %p2393_p13  ;;  %p2442_p1 = por %p2441_p0, %p2440_p12 }
  0x46   : > { %p2436_p9 = pneg %p2435_p7 }
  0x48   : > { %p2443_p4 = pnand %p2442_p1, %p2436_p9 }
  0x4a   : > { %2446 = shalt.err (!%p2443_p4)
}
  0x4b   : > { %2293 = dma.hbm_to_vmem [thread:$0]  (!%p2745_p11), %s3143_s13, 512, %s2749_s18, [#allocation6], %s2567_s16, %s2567_s16, %s2568_s19  }
  0x4c   : > { %s48_s15 = sadd.s32 1, %s2559_s17  ;;  %s55_s0 = sadd.s32 1, %s2551_s20 }
  0x4d   : > { %p50_p13 = scmp.ge.s32.totalorder %s48_s15, 2  ;;  %p62_p6 = scmp.ne.s32.totalorder %s2551_s20, %s2547_s30 }
  0x4e   : > { %p63_p10 = scmp.eq.s32.totalorder %s2563_s1, 0  ;;  %p2304_p3 = scmp.lt.s32.totalorder %s2563_s1, 2 }
  0x4f   : > { %s3208_s15 = smov (%p50_p13, %s48_s15), 0  ;;  %p2813_p7 = por %p2718_p2, %p62_p6 }
  0x50   : > { %p64_p5 = por %p63_p10, %p62_p6  ;;  %s52_s21 = ssub.s32 %s2559_s17, %s3208_s15 }
  0x51   : > { %s3181_s28 = scalar_select %p2813_p7, 1, 0 }
  0x52   : > { %s572_s29 = sand.u32 1, %s2551_s20   ;;  %p53_p9 = scmp.eq.s32.totalorder %s52_s21, 0 }
  0x53   : > { %s2030_s18 = sshll.u32 %s572_s29, 3  ;;  %s2031_s16 = sshll.u32 %s2559_s17, 7 }
  0x54   : > { %s2822_s19 = scalar_select %p53_p9, %s2551_s20, %s55_s0  }
  0x55   : > { %s3182_s25 = sld [smem:[#allocation15_spill]]  ;;  %s576_s23 = scalar_lea.vmem [#allocation2], %s2030_s18 }
  0x56   : > { %s583_s12 = sshll.u32 %s576_s23, 4  ;;  %p2831_p2 = pnand %p2304_p3, %p64_p5  ;;  %s2835_s12 = int_to_ptr.vmem [resolvable:$true] %s583_s12 }
  0x57   : > { %s573_s0 = scalar_lea.sflag [#allocation3], %s572_s29 }
  0x58   : > { %p2449_p12 = pneg %p2831_p2 }
  0x5b   : > { %s2827_s27 = scalar_lea.hbm %s3182_s25, %s2031_s16  ;;  %s2452_s22 = scalar_lea.hbm %s3182_s25, 256 }
  0x5c   : > { %s2447_s21 = scalar_lea.hbm %s2827_s27, 128  ;;  %p2453_p4 = scmp.lt.u32.totalorder %s2827_s27, %s3182_s25 }
  0x5d   : > { %p2448_p11 = scmp.ne.s32.totalorder %s2827_s27, %s2447_s21  ;;  %p2454_p13 = scmp.lt.u32.totalorder %s2452_s22, %s2447_s21 }
  0x5e   : > { %p2456_p10 = scmp.lt.u32.totalorder %s2447_s21, %s2827_s27 }
  0x5f   : > { %p2450_p0 = pnand %p2449_p12, %p2448_p11  ;;  %p2455_p6 = por %p2454_p13, %p2453_p4 }
  0x61   : > { %p2451_p1 = pneg %p2450_p0  ;;  %p2457_p3 = por %p2456_p10, %p2455_p6 }
  0x63   : > { %p2458_p5 = pnand %p2457_p3, %p2451_p1 }
  0x65   : > { %2461 = shalt.err (!%p2458_p5)
}
  0x66   : > { %s2462_s29 = scalar_lea.vmem %s2835_s12, 128  ;;  %s2569_s18 = smov [#allocation2]  }
  0x67   : > { %p2463_p9 = scmp.ne.s32.totalorder %s2835_s12, %s2462_s29  ;;  %s2467_s16 = sshll.u32 %s2569_s18, 4  ;;  %s2468_s16 = int_to_ptr.vmem [resolvable:$false] %s2467_s16 }
  0x68   : > { %s2469_s26 = scalar_lea.vmem %s2468_s16, 256  ;;  %p2470_p7 = scmp.lt.s32.totalorder %s2835_s12, %s2468_s16 }
  0x69   : > { %p2465_p11 = pnand %p2463_p9, %p2449_p12  ;;  %p2471_p4 = scmp.lt.s32.totalorder %s2469_s26, %s2462_s29 }
  0x6b   : > { %p2466_p0 = pneg %p2465_p11  ;;  %p2472_p13 = por %p2471_p4, %p2470_p7 }
  0x6d   : > { %p2473_p6 = pnand %p2472_p13, %p2466_p0 }
  0x6f   : > { %2476 = shalt.err (!%p2473_p6)
}
  0x70   : > { %2297 = dma.hbm_to_vmem [thread:$0]  (!%p2831_p2), %s2827_s27, 128, %s2835_s12, %s573_s0  }
  0x71   : > { %592 = sbr.rel (%p2734_p8) target bundleno = 2685 (0xa7d), region = 96  ;;  %s2865_s21 = sand.u32 (!%p2734_p8), 1, %s2547_s30  }
  0x72   : > { %s2033_s22 = sshll.u32 (!%p2734_p8), %s2865_s21, 3  ;;  %s595_s23 = scalar_lea.sflag (!%p2734_p8), [#allocation3], %s2865_s21 }
  0x73   : > { %s598_s29 = scalar_lea.vmem (!%p2734_p8), [#allocation2], %s2033_s22  ;;  %p3184_p7 = scmp.ne.s32.totalorder (!%p2734_p8), %s3176_s24, 0 }
  0x78   : > { %2530 = dma.done.wait (%p3184_p7), %s595_s23, 128  }
  0x79   : > { %2532 = vsyncadd (%p3184_p7), %s595_s23, 4294967168  ;;  %p3185_p2 = scmp.ne.s32.totalorder %s3174_s2, 0 }
  0x7b   : > { %2534 = dma.done.wait (%p3185_p2), [#allocation6], 1024  }
  0x7c   : > { %2536 = vsyncadd (%p3185_p2), [#allocation6], 4294966272  ;;  %vm664_vm0 = vcmask 261120   ;;  %v2879_v0 = vld [vmem:[%s598_s29] sm:$0xff]  ;;  %s3186_s27 = sld [smem:[#allocation16_spill]]  ;;  %s3187_s5 = sld [smem:[#allocation20_spill]] }
  0x7d   : > { %v665_v1 = vsel %vm664_vm0, %v2879_v0, 0.0  ;;  %v2570_v10 = vmov 0.0|0.0   ;;  %vm2571_vm1 = vmmov 0   ;;  %v2572_v18 = vmov 0.0   ;;  %v2037_v25 = vld [vmem:[%s3139_s9] ss:$0 sm:$0xff] }
  0x7e   : > { %666 = vadd.xlane.f32.xlu0 %v665_v1  ;;  %2233 = vmatprep.subr.bf16.mxu1 %v2570_v10  ;;  %s3188_s23 = sld [smem:[#allocation18_spill]]  ;;  %v2038_v29 = vld [vmem:[%s3140_s10] ss:$0 sm:$0xff]  ;;  %s3189_s29 = sld [smem:[#allocation17_spill]]  ;;  %vm939_vm2 = vcmask 64512   ;;  %vm1609_vm3 = vcmask 130048  }
  0x7f   : > { %2245 = vmatprep.subr.bf16.mxu0 %v2570_v10  ;;  %2127 = vmatprep.mubr.msk.f32.mxu1 %vm2571_vm1, %v2572_v18  ;;  %s2573_s24 = smov 120   ;;  %s3190_s4 = sld [smem:[#allocation19_spill]]  ;;  %v2043_v46 = vld [vmem:[%s3136_s6] ss:$0 sm:$0xff]  ;;  %vm1611_vm4 = vcmask 195584   ;;  %vm1835_vm5 = vcmask 523264  }
  0x80   : > { %2149 = vmatprep.mubr.msk.f32.mxu0 %vm2571_vm1, %v2572_v18  ;;  %s2574_s0 = smov 112   ;;  %s2575_s18 = smov 104  }
  0x81   : > { %s2576_s16 = smov 8   ;;  %s2577_s26 = smov 16  }
  0x82   : > { %v693_v7 = vld [vmem:[%s3186_s27] sm:$0xff]  ;;  %v694_v8 = vld [vmem:[%s3186_s27 + $0x8] sm:$0xff]  ;;  %v695_v13 = vld [vmem:[%s3186_s27 + $0x10] sm:$0xff]  ;;  %s3195_s2 = sld [smem:[#allocation24_spill]]  ;;  %s660_s14 = scalar_lea.vmem [#allocation8], %s2033_s22 }
  0x83   : > { %v858_v9 = vld [vmem:[%s3187_s5] sm:$0xff]  ;;  %v2234_v11 = vpack.c.bf16 %v694_v8, %v693_v7  ;;  %v859_v12 = vld [vmem:[%s3187_s5 + $0x8] sm:$0xff]  ;;  %v696_v14 = vld [vmem:[%s3186_s27 + $0x18] sm:$0xff]  ;;  %p3197_p12 = scmp.ne.s32.totalorder %s3181_s28, 0  ;;  %s2579_s22 = smov [#allocation8]  }
  0x84   : > { %v2246_v15 = vpack.c.bf16 %v859_v12, %v858_v9  ;;  %v860_v16 = vld [vmem:[%s3187_s5 + $0x10] sm:$0xff]  ;;  %v861_v17 = vld [vmem:[%s3187_s5 + $0x18] sm:$0xff]  ;;  %v2237_v19 = vpack.c.bf16 %v696_v14, %v695_v13  ;;  %v777_v27 = vld [vmem:[%s3188_s23] sm:$0xff]  ;;  %s2481_s3 = sshll.u32 %s2579_s22, 4  ;;  %s2482_s3 = int_to_ptr.vmem [resolvable:$false] %s2481_s3 }
  0x85   : > { %2235 = vmatpush3.bf16.msra.mxu1 %v2234_v11  ;;  %v2249_v20 = vpack.c.bf16 %v861_v17, %v860_v16  ;;  %v778_v28 = vld [vmem:[%s3188_s23 + $0x8] sm:$0xff]  ;;  %v779_v33 = vld [vmem:[%s3188_s23 + $0x10] sm:$0xff]  ;;  %v780_v34 = vld [vmem:[%s3188_s23 + $0x18] sm:$0xff] }
  0x86   : > { %2247 = vmatpush3.bf16.msra.mxu0 %v2246_v15  ;;  %2236 = vmatprep.subr.bf16.mxu1 %v2570_v10  ;;  %v2240_v31 = vpack.c.bf16 %v778_v28, %v777_v27  ;;  %v2243_v35 = vpack.c.bf16 %v780_v34, %v779_v33  ;;  %v2039_v36 = vld [vmem:[%s3189_s29] ss:$0 sm:$0xff]  ;;  %s2578_s29 = smov 24  }
  0x87   : > { %2248 = vmatprep.subr.bf16.mxu0 %v2570_v10  ;;  %v2041_v42 = vld [vmem:[%s3190_s4] ss:$0 sm:$0xff]  ;;  %s3196_s4 = sld [smem:[#allocation25_spill]] }
  0x89   : > { %2238 = vmatpush3.bf16.msra.mxu1 %v2237_v19 }
  0x8a   : > { %2250 = vmatpush3.bf16.msra.mxu0 %v2249_v20  ;;  %2239 = vmatprep.subr.bf16.mxu1 %v2570_v10 }
  0x8b   : > { %2162 = vmatprep.subr.mxu0 %v2572_v18 }
 0x10b   : > { %v667_v2 = vpop.xlane.xlu0 %666 }
 0x10c   : > { %v669_v3 = vmul.f32 0.03125, %v667_v2 }
 0x10e   : > { %v670_v4 = vsub.f32 %v2879_v0, %v669_v3 }
 0x110   : > { %v671_v5 = vmul.f32 %v670_v4, %v670_v4 }
 0x112   : > { %v672_v6 = vsel %vm664_vm0, %v671_v5, 0.0 }
 0x113   : > { %673 = vadd.xlane.f32.xlu0 %v672_v6 }
 0x1a0   : > { %v674_v21 = vpop.xlane.xlu0 %673 }
 0x1a1   : > { %v675_v22 = vmul.f32 0.03125, %v674_v21 }
 0x1a3   : > { %v676_v23 = vadd.f32 1e-06, %v675_v22 }
 0x1a5   : > { %2369 = vrsqrt.f32 %v676_v23 }
 0x1af   : > { %v2370_v24 = vpop.eup %2369 }
 0x1b0   : > { %v678_v26 = vmul.f32 %v2370_v24, %v670_v4 }
 0x1b2   : > { %v685_v30 = vmul.f32 %v2037_v25, %v678_v26 }
 0x1b4   : > { %v692_v32 = vadd.f32 %v2038_v29, %v685_v30 }
 0x1b6   : > { %2128 = vmatmul.mubr.msk.f32.vlgmr.msra.gmra.mrb[0].mxu1 %vm664_vm0, %v692_v32  ;;  %2150 = vmatmul.mubr.msk.f32.vlgmr.msra.gmra.mrb[0].mxu0 %vm664_vm0, %v692_v32 }
 0x1b7   : > { %2241 = vmatpush3.bf16.msra.mxu1 %v2240_v31  ;;  %2138 = vmatprep.mubr.msk.f32.mxu1 %vm2571_vm1, %v2572_v18 }
 0x1b8   : > { %2242 = vmatprep.subr.bf16.mxu1 %v2570_v10  ;;  %2164 = vmatprep.mubr.msk.f32.mxu0 %vm2571_vm1, %v2572_v18 }
 0x1bb   : > { %2244 = vmatpush3.bf16.msra.mxu1 %v2243_v35 }
 0x1bc   : > { %2152 = vmatprep.subr.mxu1 %v2572_v18 }
 0x1be   : > { %2139 = vmatmul.mubr.msk.f32.vlgmr.msra.gmra.mrb[2].mxu1 %vm664_vm0, %v692_v32 }
 0x1bf   : > { %2154 = vmatprep.mubr.msk.f32.mxu1 %vm2571_vm1, %v2572_v18 }
 0x289   : > { %v773_v37 = vpop.f32.mrb[0].mxu1  ;;  %v935_v38 = vpop.f32.mrb[0].mxu0 }
 0x28a   : > { %v774_v39 = vadd.f32 %v2039_v36, %v773_v37  ;;  %v2129_v40 = vpop.f32.mrb[1].mxu1  ;;  %v2151_v41 = vpop.f32.mrb[1].mxu0  ;;  %v2962_v47 = vadd.f32 %v2043_v46, %v935_v38  ;;  %v1616_v46 = vld [vmem:[#allocation5 + $0x18] sm:$0xff] }
 0x28c   : > { %1100 = vrot.lane.b32.xlu1 %v774_v39, %s2573_s24 }
 0x291   : > { %v854_v43 = vpop.f32.mrb[2].mxu1 }
 0x292   : > { %v855_v44 = vadd.f32 %v2041_v42, %v854_v43  ;;  %v2140_v45 = vpop.f32.mrb[3].mxu1  ;;  %v1613_v42 = vld [vmem:[#allocation5] sm:$0xff]  ;;  %v1614_v43 = vld [vmem:[#allocation5 + $0x8] sm:$0xff] }
 0x293   : > { %v2252_v45 = vpack.c.bf16 %v1614_v43, %v1613_v42 }
 0x294   : > { %1268 = vrot.lane.b32.xlu0 %v855_v44, %s2574_s0  ;;  %1102 = vrot.lane.b32.xlu1 %v855_v44, %s2573_s24 }
 0x295   : > { %2153 = vmatpush3.xpose.msk.msra.mxu1 %vm939_vm2, %v855_v44 }
 0x296   : > { %2157 = vmatprep.subr.mxu1 %v2572_v18 }
 0x298   : > { %2155 = vmatmul.mubr.msk.f32.vlgmr.msra.gmra.mrb[4].mxu1 %vm939_vm2, %v774_v39  ;;  %1266 = vrot.lane.b32.xlu1 %v774_v39, %s2574_s0 }
 0x299   : > { %2158 = vmatpush3.msra.mxu1 %v2962_v47  ;;  %2159 = vmatprep.mubr.msk.f32.mxu1 %vm2571_vm1, %v2572_v18 }
 0x29a   : > { %2167 = vmatprep.subr.mxu1 %v2572_v18 }
 0x29c   : > { %1433 = vrot.lane.b32.xlu1 %v855_v44, %s2575_s18  ;;  %v1615_v44 = vld [vmem:[#allocation5 + $0x10] sm:$0xff] }
 0x2a0   : > { %1431 = vrot.lane.b32.xlu1 %v774_v39, %s2575_s18 }
 0x2fe   : > { %v1101_v48 = vpop.permute.xlu1 %1100 }
 0x306   : > { %v1103_v49 = vpop.permute.xlu1 %1102  ;;  %v1269_v50 = vpop.permute.xlu0 %1268 }
 0x307   : > { %2163 = vmatpush3.xpose.msk.msra.mxu0 %vm939_vm2, %v1103_v49 }
 0x308   : > { %2172 = vmatprep.subr.mxu0 %v2572_v18 }
 0x30a   : > { %2165 = vmatmul.mubr.msk.f32.vlgmr.msra.gmra.mrb[2].mxu0 %vm939_vm2, %v1101_v48  ;;  %v1267_v51 = vpop.permute.xlu1 %1266 }
 0x30b   : > { %2173 = vmatpush3.xpose.msk.msra.mxu0 %vm939_vm2, %v1269_v50  ;;  %2174 = vmatprep.mubr.msk.f32.mxu0 %vm2571_vm1, %v2572_v18 }
 0x30c   : > { %2182 = vmatprep.subr.mxu0 %v2572_v18 }
 0x30e   : > { %2175 = vmatmul.mubr.msk.f32.vlgmr.msra.gmra.mrb[4].mxu0 %vm939_vm2, %v1267_v51  ;;  %v1434_v52 = vpop.permute.xlu1 %1433 }
 0x30f   : > { %2183 = vmatpush3.xpose.msk.msra.mxu0 %vm939_vm2, %v1434_v52  ;;  %2184 = vmatprep.mubr.msk.f32.mxu0 %vm2571_vm1, %v2572_v18 }
 0x310   : > { %2251 = vmatprep.subr.bf16.mxu0 %v2570_v10 }
 0x312   : > { %v1432_v53 = vpop.permute.xlu1 %1431 }
 0x313   : > { %2185 = vmatmul.mubr.msk.f32.vlgmr.msra.gmra.mrb[6].mxu0 %vm939_vm2, %v1432_v53 }
 0x314   : > { %2200 = vmatprep.mubr.msk.f32.mxu0 %vm2571_vm1, %v2572_v18  ;;  %2253 = vmatpush3.bf16.msra.mxu0 %v2252_v45 }
 0x315   : > { %2254 = vmatprep.subr.bf16.mxu0 %v2570_v10 }
 0x36b   : > { %v1012_v54 = vpop.f32.mrb[4].mxu1 }
 0x36c   : > { %v2156_v55 = vpop.f32.mrb[5].mxu1  ;;  %v1016_v56 = vsel %vm939_vm2, %v1012_v54, -inf }
 0x36d   : > { %1017 = vmax.xlane.f32.xlu1 %v1016_v56 }
 0x3dd   : > { %v1174_v57 = vpop.f32.mrb[2].mxu0 }
 0x3de   : > { %v2166_v58 = vpop.f32.mrb[3].mxu0  ;;  %v1178_v59 = vsel %vm939_vm2, %v1174_v57, -inf }
 0x3df   : > { %1179 = vmax.xlane.f32.xlu0 %v1178_v59 }
 0x3e1   : > { %v1340_v60 = vpop.f32.mrb[4].mxu0 }
 0x3e2   : > { %v2176_v61 = vpop.f32.mrb[5].mxu0  ;;  %v1344_v62 = vsel %vm939_vm2, %v1340_v60, -inf }
 0x3e3   : > { %1345 = vmax.xlane.f32.xlu1 %v1344_v62 }
 0x3e6   : > { %v1505_v63 = vpop.f32.mrb[6].mxu0 }
 0x3e7   : > { %v2186_v1 = vpop.f32.mrb[7].mxu0  ;;  %v1509_v2 = vsel %vm939_vm2, %v1505_v63, -inf }
 0x3e8   : > { %1510 = vmax.xlane.f32.xlu1 %v1509_v2 }
 0x3fa   : > { %v1018_v3 = vpop.xlane.xlu1 %1017 }
 0x3fb   : > { %v1019_v4 = vsub.f32 %v1012_v54, %v1018_v3 }
 0x3fd   : > { %v1020_v5 = vmul.f32 1.442695, %v1019_v4 }
 0x3ff   : > { %2371 = vpow2.f32 %v1020_v5 }
 0x409   : > { %v2372_v6 = vpop.eup %2371 }
 0x40a   : > { %v1022_v7 = vsel %vm939_vm2, %v2372_v6, 0.0 }
 0x40b   : > { %1023 = vadd.xlane.f32.xlu0 %v1022_v7  ;;  %v1727_v7 = vld [vmem:[#allocation7] sm:$0xff] }
 0x46c   : > { %v1180_v8 = vpop.xlane.xlu0 %1179 }
 0x46d   : > { %v1181_v9 = vsub.f32 %v1174_v57, %v1180_v8  ;;  %v1728_v8 = vld [vmem:[#allocation7 + $0x8] sm:$0xff] }
 0x46f   : > { %v1182_v11 = vmul.f32 1.442695, %v1181_v9  ;;  %v2258_v9 = vpack.c.bf16 %v1728_v8, %v1727_v7 }
 0x470   : > { %v1346_v12 = vpop.xlane.xlu1 %1345 }
 0x471   : > { %2373 = vpow2.f32 %v1182_v11  ;;  %v1347_v13 = vsub.f32 %v1340_v60, %v1346_v12  ;;  %v2057_v60 = vld [vmem:[%s3138_s8] ss:$0 sm:$0xff]  ;;  %v1730_v11 = vld [vmem:[#allocation7 + $0x18] sm:$0xff] }
 0x473   : > { %v1348_v14 = vmul.f32 1.442695, %v1347_v13 }
 0x475   : > { %2375 = vpow2.f32 %v1348_v14  ;;  %v1511_v21 = vpop.xlane.xlu1 %1510 }
 0x476   : > { %v1512_v22 = vsub.f32 %v1505_v63, %v1511_v21 }
 0x478   : > { %v1513_v23 = vmul.f32 1.442695, %v1512_v22 }
 0x47b   : > { %v2374_v15 = vpop.eup %2373 }
 0x47c   : > { %v1184_v16 = vsel %vm939_vm2, %v2374_v15, 0.0 }
 0x47d   : > { %1185 = vadd.xlane.f32.xlu1 %v1184_v16 }
 0x47f   : > { %v2376_v17 = vpop.eup %2375 }
 0x480   : > { %v1350_v19 = vsel %vm939_vm2, %v2376_v17, 0.0 }
 0x481   : > { %1351 = vadd.xlane.f32.xlu0 %v1350_v19 }
 0x48e   : > { %1355 = vrot.lane.b32.xlu1 %v2962_v47, %s2574_s0  ;;  %s1926_s0 = sshll.u32 %s660_s14, 4  ;;  %s3082_s0 = int_to_ptr.vmem [resolvable:$true] %s1926_s0 }
 0x48f   : > { %p2484_p3 = scmp.lt.s32.totalorder %s3082_s0, %s2482_s3 }
 0x497   : > { %1190 = vrot.lane.b32.xlu0 %v2962_v47, %s2573_s24  ;;  %s2477_s24 = scalar_lea.vmem %s3082_s0, 128 }
 0x498   : > { %v1024_v20 = vpop.xlane.xlu0 %1023  ;;  %p2478_p8 = scmp.ne.s32.totalorder %s3082_s0, %s2477_s24 }
 0x499   : > { %2377 = vrcp.f32 %v1024_v20 }
 0x49a   : > { %2379 = vpow2.f32 %v1513_v23  ;;  %p2479_p1 = pnand %p2478_p8, %p3197_p12 }
 0x49c   : > { %p2480_p10 = pneg %p2479_p1 }
 0x4a3   : > { %v2378_v24 = vpop.eup %2377 }
 0x4a4   : > { %v1026_v25 = vmul.f32 %v2378_v24, %v2372_v6  ;;  %v2380_v26 = vpop.eup %2379 }
 0x4a5   : > { %v1515_v27 = vsel %vm939_vm2, %v2380_v26, 0.0 }
 0x4a6   : > { %2160 = vmatmul.mubr.msk.f32.vlgmr.msra.gmra.mrb[6].mxu1 %vm939_vm2, %v1026_v25 }
 0x4a7   : > { %2169 = vmatprep.mubr.msk.f32.mxu1 %vm2571_vm1, %v2572_v18 }
 0x4b2   : > { %1516 = vadd.xlane.f32.xlu1 %v1515_v27 }
 0x4c3   : > { %1520 = vrot.lane.b32.xlu1 %v2962_v47, %s2575_s18  ;;  %v2255_v47 = vpack.c.bf16 %v1616_v46, %v1615_v44  ;;  %s3191_s18 = sld [smem:[#allocation21_spill]] }
 0x4c5   : > { %2256 = vmatpush3.bf16.msra.mxu0 %v2255_v47  ;;  %v2063_v47 = vld [vmem:[%s3195_s2] ss:$0 sm:$0xff]  ;;  %s2483_s2 = scalar_lea.vmem %s2482_s3, 256 }
 0x4c6   : > { %2263 = vmatprep.subr.bf16.mxu0 %v2570_v10  ;;  %p2485_p5 = scmp.lt.s32.totalorder %s2483_s2, %s2477_s24 }
 0x4c8   : > { %p2486_p9 = por %p2485_p5, %p2484_p3 }
 0x4c9   : > { %v2060_v20 = vld [vmem:[%s3191_s18] ss:$0 sm:$0xff] }
 0x4ca   : > { %p2487_p11 = pnand %p2486_p9, %p2480_p10 }
 0x50a   : > { %v1186_v28 = vpop.xlane.xlu1 %1185 }
 0x50b   : > { %2381 = vrcp.f32 %v1186_v28 }
 0x50e   : > { %v1352_v29 = vpop.xlane.xlu0 %1351  ;;  %v1356_v33 = vpop.permute.xlu1 %1355 }
 0x50f   : > { %2383 = vrcp.f32 %v1352_v29 }
 0x512   : > { %v1191_v30 = vpop.permute.xlu0 %1190 }
 0x513   : > { %2168 = vmatpush3.msra.mxu1 %v1191_v30 }
 0x514   : > { %2177 = vmatprep.subr.mxu1 %v2572_v18 }
 0x515   : > { %v2382_v31 = vpop.eup %2381 }
 0x516   : > { %v1188_v32 = vmul.f32 %v2382_v31, %v2374_v15 }
 0x518   : > { %2170 = vmatmul.mubr.msk.f32.vlgmr.msra.gmra.mrb[8].mxu1 %vm939_vm2, %v1188_v32 }
 0x519   : > { %v2384_v34 = vpop.eup %2383  ;;  %2178 = vmatpush3.msra.mxu1 %v1356_v33  ;;  %2179 = vmatprep.mubr.msk.f32.mxu1 %vm2571_vm1, %v2572_v18 }
 0x51a   : > { %v1354_v35 = vmul.f32 %v2384_v34, %v2376_v17  ;;  %2187 = vmatprep.subr.mxu1 %v2572_v18  ;;  %v2059_v17 = vld [vmem:[%s3141_s11] ss:$0 sm:$0xff] }
 0x51c   : > { %2180 = vmatmul.mubr.msk.f32.vlgmr.msra.gmra.mrb[10].mxu1 %vm939_vm2, %v1354_v35 }
 0x51d   : > { %2189 = vmatprep.mubr.msk.f32.mxu1 %vm2571_vm1, %v2572_v18 }
 0x53f   : > { %v1517_v36 = vpop.xlane.xlu1 %1516 }
 0x540   : > { %2385 = vrcp.f32 %v1517_v36 }
 0x543   : > { %v1521_v37 = vpop.permute.xlu1 %1520 }
 0x544   : > { %2188 = vmatpush3.msra.mxu1 %v1521_v37 }
 0x545   : > { %2257 = vmatprep.subr.bf16.mxu1 %v2570_v10 }
 0x54a   : > { %v2386_v38 = vpop.eup %2385 }
 0x54b   : > { %v1519_v39 = vmul.f32 %v2386_v38, %v2380_v26 }
 0x54d   : > { %2190 = vmatmul.mubr.msk.f32.vlgmr.msra.gmra.mrb[12].mxu1 %vm939_vm2, %v1519_v39 }
 0x54e   : > { %2211 = vmatprep.mubr.msk.f32.mxu1 %vm2571_vm1, %v2572_v18  ;;  %2259 = vmatpush3.bf16.msra.mxu1 %v2258_v9 }
 0x54f   : > { %2260 = vmatprep.subr.bf16.mxu1 %v2570_v10 }
 0x579   : > { %v1096_v40 = vpop.f32.mrb[6].mxu1 }
 0x57a   : > { %v2161_v41 = vpop.f32.mrb[7].mxu1 }
 0x5eb   : > { %v1262_v48 = vpop.f32.mrb[8].mxu1 }
 0x5ec   : > { %1597 = vrot.lane.b32.xlu0 %v1262_v48, %s2576_s16  ;;  %v2171_v49 = vpop.f32.mrb[9].mxu1  ;;  %s3193_s16 = sld [smem:[#allocation22_spill]] }
 0x5ef   : > { %v1427_v50 = vpop.f32.mrb[10].mxu1 }
 0x5f0   : > { %1601 = vrot.lane.b32.xlu1 %v1427_v50, %s2577_s26  ;;  %v2181_v51 = vpop.f32.mrb[11].mxu1  ;;  %s3194_s26 = sld [smem:[#allocation13_spill]] }
 0x5f2   : > { %v2061_v35 = vld [vmem:[%s3193_s16] ss:$0 sm:$0xff] }
 0x5f6   : > { %s2066_s12 = sshll.u32 %s3194_s26, 7  ;;  %s1912_s26 = scalar_lea.sflag [#allocation4], %s2865_s21 }
 0x5f7   : > { %s3080_s5 = scalar_lea.hbm %s3196_s4, %s2066_s12 }
 0x620   : > { %v1592_v52 = vpop.f32.mrb[12].mxu1 }
 0x621   : > { %1605 = vrot.lane.b32.xlu0 %v1592_v52, %s2578_s29  ;;  %v2191_v53 = vpop.f32.mrb[13].mxu1  ;;  %s3192_s29 = sld [smem:[#allocation23_spill]] }
 0x627   : > { %v1820_v23 = vld [vmem:[%s3192_s29] sm:$0xff]  ;;  %v1821_v24 = vld [vmem:[%s3192_s29 + $0x8] sm:$0xff]  ;;  %v1822_v26 = vld [vmem:[%s3192_s29 + $0x10] sm:$0xff] }
 0x628   : > { %v2264_v25 = vpack.c.bf16 %v1821_v24, %v1820_v23  ;;  %v1823_v27 = vld [vmem:[%s3192_s29 + $0x18] sm:$0xff]  ;;  %v1824_v29 = vld [vmem:[%s3192_s29 + $0x20] sm:$0xff]  ;;  %v1825_v30 = vld [vmem:[%s3192_s29 + $0x28] sm:$0xff] }
 0x629   : > { %v2267_v28 = vpack.c.bf16 %v1823_v27, %v1822_v26  ;;  %v2270_v31 = vpack.c.bf16 %v1825_v30, %v1824_v29  ;;  %v1826_v32 = vld [vmem:[%s3192_s29 + $0x30] sm:$0xff]  ;;  %v1827_v33 = vld [vmem:[%s3192_s29 + $0x38] sm:$0xff] }
 0x62a   : > { %v2273_v34 = vpack.c.bf16 %v1827_v33, %v1826_v32 }
 0x65e   : > { %v1598_v54 = vpop.permute.xlu0 %1597 }
 0x65f   : > { %v1608_v56 = vsel %vm939_vm2, %v1096_v40, %v1598_v54 }
 0x662   : > { %v1602_v55 = vpop.permute.xlu1 %1601 }
 0x663   : > { %v1610_v57 = vsel %vm1609_vm3, %v1608_v56, %v1602_v55 }
 0x693   : > { %v1606_v58 = vpop.permute.xlu0 %1605 }
 0x694   : > { %v1612_v59 = vsel %vm1611_vm4, %v1610_v57, %v1606_v58 }
 0x695   : > { %2201 = vmatmul.mubr.msk.f32.vlgmr.msra.gmra.mrb[8].mxu0 %vm664_vm0, %v1612_v59 }
 0x696   : > { %2230 = vmatprep.mubr.msk.f32.mxu0 %vm2571_vm1, %v2572_v18  ;;  %2265 = vmatpush3.bf16.msra.mxu0 %v2264_v25 }
 0x697   : > { %2266 = vmatprep.subr.bf16.mxu0 %v2570_v10 }
 0x69a   : > { %2268 = vmatpush3.bf16.msra.mxu0 %v2267_v28 }
 0x69b   : > { %2269 = vmatprep.subr.bf16.mxu0 %v2570_v10 }
 0x69e   : > { %2271 = vmatpush3.bf16.msra.mxu0 %v2270_v31 }
 0x69f   : > { %2272 = vmatprep.subr.bf16.mxu0 %v2570_v10 }
 0x6a2   : > { %2274 = vmatpush3.bf16.msra.mxu0 %v2273_v34 }
 0x768   : > { %v1693_v61 = vpop.f32.mrb[8].mxu0 }
 0x769   : > { %v1694_v62 = vadd.f32 %v2057_v60, %v1693_v61  ;;  %v2202_v63 = vpop.f32.mrb[9].mxu0 }
 0x76b   : > { %v3026_v1 = vadd.f32 %v1694_v62, %v2879_v0  ;;  %v1729_v0 = vld [vmem:[#allocation7 + $0x10] sm:$0xff] }
 0x76c   : > { %v2261_v12 = vpack.c.bf16 %v1730_v11, %v1729_v0 }
 0x76d   : > { %v1700_v2 = vsel %vm664_vm0, %v3026_v1, 0.0 }
 0x76e   : > { %1701 = vadd.xlane.f32.xlu1 %v1700_v2  ;;  %2262 = vmatpush3.bf16.msra.mxu1 %v2261_v12 }
 0x7fb   : > { %v1702_v3 = vpop.xlane.xlu1 %1701 }
 0x7fc   : > { %v1703_v4 = vmul.f32 0.03125, %v1702_v3 }
 0x7fe   : > { %v1704_v5 = vsub.f32 %v3026_v1, %v1703_v4 }
 0x800   : > { %v1705_v6 = vmul.f32 %v1704_v5, %v1704_v5 }
 0x802   : > { %v1706_v18 = vsel %vm664_vm0, %v1705_v6, 0.0 }
 0x803   : > { %1707 = vadd.xlane.f32.xlu0 %v1706_v18 }
 0x890   : > { %v1708_v13 = vpop.xlane.xlu0 %1707 }
 0x891   : > { %v1709_v14 = vmul.f32 0.03125, %v1708_v13 }
 0x893   : > { %v1710_v15 = vadd.f32 1e-06, %v1709_v14 }
 0x895   : > { %2387 = vrsqrt.f32 %v1710_v15 }
 0x89f   : > { %v2388_v16 = vpop.eup %2387 }
 0x8a0   : > { %v1712_v19 = vmul.f32 %v2388_v16, %v1704_v5 }
 0x8a2   : > { %v1719_v21 = vmul.f32 %v2059_v17, %v1712_v19 }
 0x8a4   : > { %v1726_v22 = vadd.f32 %v2060_v20, %v1719_v21 }
 0x8a6   : > { %2212 = vmatmul.mubr.msk.f32.vlgmr.msra.gmra.mrb[14].mxu1 %vm664_vm0, %v1726_v22 }
 0x979   : > { %v1807_v36 = vpop.f32.mrb[14].mxu1 }
 0x97a   : > { %v1808_v37 = vadd.f32 %v2061_v35, %v1807_v36  ;;  %v2213_v38 = vpop.f32.mrb[15].mxu1 }
 0x97c   : > { %v1811_v10 = vmul.f32 %v1808_v37, %v1808_v37 }
 0x97e   : > { %v1812_v39 = vmul.f32 %v1811_v10, %v1808_v37 }
 0x980   : > { %v1813_v40 = vmul.f32 0.044715, %v1812_v39 }
 0x982   : > { %v1814_v41 = vadd.f32 %v1813_v40, %v1808_v37 }
 0x984   : > { %v1815_v42 = vmul.f32 0.7978846, %v1814_v41 }
 0x986   : > { %2389 = vtanh.f32 %v1815_v42 }
 0x990   : > { %v2390_v43 = vpop.eup %2389 }
 0x991   : > { %v1817_v44 = vadd.f32 1.0, %v2390_v43 }
 0x993   : > { %v1818_v45 = vmul.f32 0.5, %v1817_v44 }
 0x995   : > { %v1819_v46 = vmul.f32 %v1818_v45, %v1808_v37 }
 0x997   : > { %2231 = vmatmul.mubr.msk.f32.vlgmr.msra.gmra.mrb[10].mxu0 %vm1835_vm5, %v1819_v46 }
 0xa6a   : > { %v1905_v48 = vpop.f32.mrb[10].mxu0 }
 0xa6b   : > { %v1906_v49 = vadd.f32 %v2063_v47, %v1905_v48  ;;  %v2232_v50 = vpop.f32.mrb[11].mxu0 }
 0xa6d   : > { %v1909_v51 = vadd.f32 %v1906_v49, %v3026_v1 }
 0xa6f   : > { %1910 = vst.msk [vmem:[%s660_s14] sm:$0xff] %vm664_vm0, %v1909_v51 }
 0xa70   : > { %2490 = shalt.err (!%p2487_p11)
}
 0xa71   : > { %s2491_s21 = scalar_lea.hbm %s3080_s5, 128  ;;  %s2495_s18 = scalar_lea.hbm %s3196_s4, 256 }
 0xa72   : > { %p2492_p0 = scmp.ne.s32.totalorder %s3080_s5, %s2491_s21  ;;  %p2496_p6 = scmp.lt.u32.totalorder %s3080_s5, %s3196_s4 }
 0xa73   : > { %p2497_p7 = scmp.lt.u32.totalorder %s2495_s18, %s2491_s21  ;;  %p2499_p8 = scmp.lt.u32.totalorder %s2491_s21, %s3080_s5 }
 0xa74   : > { %p2493_p4 = pnand %p2492_p0, %p3197_p12 }
 0xa75   : > { %p2498_p2 = por %p2497_p7, %p2496_p6 }
 0xa76   : > { %p2494_p13 = pneg %p2493_p4 }
 0xa77   : > { %p2500_p1 = por %p2499_p8, %p2498_p2 }
 0xa79   : > { %p2501_p10 = pnand %p2500_p1, %p2494_p13 }
 0xa7b   : > { %2504 = shalt.err (!%p2501_p10)
}
 0xa7c   : > { %2285 = dma.vmem_to_hbm [thread:$0]  (%p3197_p12), %s3082_s0, 128, %s3080_s5, %s1912_s26  }
 0xa7d PF: > { %s3198_s24 = sld [smem:[#allocation12_spill]]  ;;  %s3199_s3 = sld [smem:[#allocation14_spill]] }
 0xa7e   : > { %p3201_p5 = scmp.ge.s32.totalorder %s2563_s1, 2 }
 0xa83   : > { %s1938_s2 = sand.u32 1, %s3198_s24   ;;  %p3200_p3 = scmp.ne.s32.totalorder %s3199_s3, 0 }
 0xa84   : > { %s1939_s12 = scalar_lea.sflag [#allocation4], %s1938_s2 }
 0xa85   : > { %p2299_p9 = pnand %p3201_p5, %p3200_p3 }
 0xa87   : > { %2538 = dma.done.wait (!%p2299_p9), %s1939_s12, 128  }
 0xa88   : > { %2540 = vsyncadd (!%p2299_p9), %s1939_s12, 4294967168  ;;  %s36_s1 = sadd.s32 1, %s2563_s1   ;;  %s3202_s0 = smov %s2547_s30 }
 0xa89   : > { %p33_p11 = scmp.ge.s32.totalorder %s36_s1, 4   ;;  %s3203_s30 = smov %s2551_s20 }
 0xa8a   : > { %s3204_s20 = smov %s2822_s19  ;;  %s3205_s21 = smov %s2559_s17 }
 0xa8b   : > { %s3206_s17 = smov %s3208_s15  ;;  %35 = sbr.rel (!%p33_p11) target bundleno = 19 (0x13), region = 149 }
 0xa92   :  { %1944 = vsyncpa [#allocation3], 1 }
 0xa93   :  { %1946 = vsyncpa [#allocation3 + $0x1], 1 }
 0xa94   :  { %1947 = vsyncpa [#allocation6], 1 }
 0xa95   :  { %1948 = vsyncpa [#allocation4], 1 }
 0xa96   :  { %1950 = vsyncpa [#allocation4 + $0x1], 1 }

</bundles_post_ra>
